<compile_context>
chip_gen: v5e
topology: v5e:2x2
jax: 0.10.0
libtpu: 0.0.40
codegen_flags: <defaults>
</compile_context>

<pallas_src>
import functools

import jax
import jax.numpy as jnp
from jax.experimental import pallas as pl
from jax.experimental.pallas import tpu as pltpu


def _mlp_kernel(x_ref, w1_ref, b1_ref, w2_ref, b2_ref, w3_ref, b3_ref, o_ref):
    # One (tm, in_dim) row tile per grid step; weights/biases are VMEM-resident.
    # Fused: MXU matmul -> f32 bias add -> EUP sigmoid -> MXU -> f32 ReLU -> MXU.
    compute_dtype = w2_ref.dtype  # bf16 (default) or f32 — wrapper's choice

    h1 = jnp.dot(x_ref[...], w1_ref[...], preferred_element_type=jnp.float32)
    h1 = jax.nn.sigmoid(h1 + b1_ref[...])                       # f32 elementwise

    h2 = jnp.dot(h1.astype(compute_dtype), w2_ref[...],
                 preferred_element_type=jnp.float32)
    h2 = jnp.maximum(h2 + b2_ref[...], 0.0)                     # f32 elementwise

    out = jnp.dot(h2.astype(compute_dtype), w3_ref[...],
                  preferred_element_type=jnp.float32)
    o_ref[...] = (out + b3_ref[...]).astype(o_ref.dtype)


def _round_up(n, m):
    return ((n + m - 1) // m) * m


@functools.partial(jax.jit, static_argnames=("tile_m", "use_bf16"))
def hidden_sigmoid_hidden_relu(x, w1, b1, w2, b2, w3, b3, *, tile_m=2048,
                               use_bf16=True):
    """x: (batch, in_dim); wK: (in, out); bK: (out,) or (1, out). Returns (batch, out_dim) f32."""
    batch, in_dim = x.shape
    h1_dim = w1.shape[1]
    h2_dim = w2.shape[1]
    out_dim = w3.shape[1]

    # Row tiling: large tiles amortize per-step overhead; when the batch is big
    # enough, keep >= 2 grid steps so v7x's two TensorCores both get work.
    # tm is kept a multiple of 16 so bf16 row tiles stay sublane-aligned.
    if batch > 128:
        tm = min(tile_m, _round_up((batch + 1) // 2, 16))
    else:
        tm = _round_up(batch, 16)
    tm = max(tm, 16)
    batch_p = _round_up(batch, tm)

    mm_dtype = jnp.bfloat16 if use_bf16 else jnp.float32
    f32 = jnp.float32

    # x streams at its natural (narrow) width; only batch rows are padded.
    xp = x.astype(mm_dtype)
    if batch_p != batch:
        xp = jnp.pad(xp, ((0, batch_p - batch), (0, 0)))

    # TODO(synk): for a real serving path, cast the weights once outside the
    #             hot call; here they ride along inside the same jit (tiny).
    w1c = w1.astype(mm_dtype)
    w2c = w2.astype(mm_dtype)
    w3c = w3.astype(mm_dtype)
    b1c = b1.astype(f32).reshape(1, h1_dim)
    b2c = b2.astype(f32).reshape(1, h2_dim)
    b3c = b3.astype(f32).reshape(1, out_dim)

    # Weights/biases: same block for every grid step -> stay VMEM-resident.
    resident = lambda shape: pl.BlockSpec(shape, lambda i: (0, 0))

    out = pl.pallas_call(
        _mlp_kernel,
        out_shape=jax.ShapeDtypeStruct((batch_p, out_dim), f32),
        grid=(batch_p // tm,),
        in_specs=[
            pl.BlockSpec((tm, in_dim), lambda i: (i, 0)),   # streamed x
            resident((in_dim, h1_dim)), resident((1, h1_dim)),
            resident((h1_dim, h2_dim)), resident((1, h2_dim)),
            resident((h2_dim, out_dim)), resident((1, out_dim)),
        ],
        out_specs=pl.BlockSpec((tm, out_dim), lambda i: (i, 0)),  # unpadded write
        compiler_params=pltpu.CompilerParams(
            dimension_semantics=("parallel",),  # megacore sharding on v7x
        ),
    )(xp, w1c, b1c, w2c, b2c, w3c, b3c)

    return out[:batch]


def init_linear(key, in_dim, out_dim):
    # Mimic PyTorch Linear default init: U(-1/sqrt(in_dim), 1/sqrt(in_dim)).
    kw, kb = jax.random.split(key)
    bound = 1.0 / jnp.sqrt(jnp.float32(in_dim))
    w = jax.random.uniform(kw, (in_dim, out_dim), jnp.float32, -bound, bound)
    b = jax.random.uniform(kb, (1, out_dim), jnp.float32, -bound, bound)
    return w, b


def reference(x, w1, b1, w2, b2, w3, b3):
    h1 = jax.nn.sigmoid(x @ w1 + b1)
    h2 = jnp.maximum(h1 @ w2 + b2, 0.0)
    return h2 @ w3 + b3


if __name__ == "__main__":
    batch, input_dim, hidden_dim1, hidden_dim2, output_dim = 8, 16, 32, 32, 4

    key = jax.random.PRNGKey(0)
    kx, k1, k2, k3, kbig = jax.random.split(key, 5)

    x = jax.random.normal(kx, (batch, input_dim), jnp.float32)
    w1, b1 = init_linear(k1, input_dim, hidden_dim1)
    w2, b2 = init_linear(k2, hidden_dim1, hidden_dim2)
    w3, b3 = init_linear(k3, hidden_dim2, output_dim)

    ref = reference(x, w1, b1, w2, b2, w3, b3)

    # f32 path: tight correctness check at module-sized shapes.
    out_f32 = jax.block_until_ready(
        hidden_sigmoid_hidden_relu(x, w1, b1, w2, b2, w3, b3, use_bf16=False)
    )
    assert out_f32.shape == (batch, output_dim), out_f32.shape
    assert jnp.allclose(out_f32, ref, atol=1e-5, rtol=1e-5), "f32 mismatch vs reference"

    # bf16-matmul path (default): loosened tolerance vs the f32 reference.
    out_bf16 = jax.block_until_ready(
        hidden_sigmoid_hidden_relu(x, w1, b1, w2, b2, w3, b3)
    )
    assert out_bf16.shape == (batch, output_dim), out_bf16.shape
    assert jnp.allclose(out_bf16, ref, atol=5e-2, rtol=5e-2), "bf16 mismatch vs reference"

    # Larger batch exercises the multi-step grid / streamed-x path (2+ steps).
    x_big = jax.random.normal(kbig, (1024, input_dim), jnp.float32)
    ref_big = reference(x_big, w1, b1, w2, b2, w3, b3)
    out_big = jax.block_until_ready(
        hidden_sigmoid_hidden_relu(x_big, w1, b1, w2, b2, w3, b3)
    )
    assert out_big.shape == (1024, output_dim), out_big.shape
    assert jnp.allclose(out_big, ref_big, atol=5e-2, rtol=5e-2), "bf16 mismatch (big batch)"

    print("KERNEL_OK")
</pallas_src>

<mosaic_0001>
module attributes {stable_mosaic.version = 11 : i64} {
  func.func @_mlp_kernel(%arg0: i32, %arg1: memref<16x16xf32, #tpu.memory_space<vmem>>, %arg2: memref<16x32xf32, #tpu.memory_space<vmem>>, %arg3: memref<1x32xf32, #tpu.memory_space<vmem>>, %arg4: memref<32x32xf32, #tpu.memory_space<vmem>>, %arg5: memref<1x32xf32, #tpu.memory_space<vmem>>, %arg6: memref<32x4xf32, #tpu.memory_space<vmem>>, %arg7: memref<1x4xf32, #tpu.memory_space<vmem>>, %arg8: memref<16x4xf32, #tpu.memory_space<vmem>>) attributes {dimension_semantics = [#tpu.dimension_semantics<parallel>], iteration_bounds = array<i64: 1>, scalar_prefetch = 0 : i64, scratch_operands = 0 : i64, tpu.core_type = #tpu.core_type<tc>, window_params = [{transform_indices = @transform_0, window_bounds = array<i64: 16, 16>}, {pipeline_mode = #tpu.pipeline_mode<synchronous>, transform_indices = @transform_1, window_bounds = array<i64: 16, 32>}, {pipeline_mode = #tpu.pipeline_mode<synchronous>, transform_indices = @transform_2, window_bounds = array<i64: 1, 32>}, {pipeline_mode = #tpu.pipeline_mode<synchronous>, transform_indices = @transform_3, window_bounds = array<i64: 32, 32>}, {pipeline_mode = #tpu.pipeline_mode<synchronous>, transform_indices = @transform_4, window_bounds = array<i64: 1, 32>}, {pipeline_mode = #tpu.pipeline_mode<synchronous>, transform_indices = @transform_5, window_bounds = array<i64: 32, 4>}, {pipeline_mode = #tpu.pipeline_mode<synchronous>, transform_indices = @transform_6, window_bounds = array<i64: 1, 4>}, {transform_indices = @transform_7, window_bounds = array<i64: 16, 4>}]} {
    %c0 = arith.constant 0 : index
    %c0_0 = arith.constant 0 : index
    %0 = vector.load %arg1[%c0, %c0_0] : memref<16x16xf32, #tpu.memory_space<vmem>>, vector<16x16xf32>
    %c0_1 = arith.constant 0 : index
    %c0_2 = arith.constant 0 : index
    %1 = vector.load %arg2[%c0_1, %c0_2] : memref<16x32xf32, #tpu.memory_space<vmem>>, vector<16x32xf32>
    %cst = arith.constant dense<0.000000e+00> : vector<16x32xf32>
    %2 = tpu.matmul %0, %1, %cst {dimension_numbers = #tpu.dot_dimension_numbers<[1], [0], [0], [1], [0, 0, 1, 1], [], []>} : vector<16x16xf32>, vector<16x32xf32>, vector<16x32xf32> -> vector<16x32xf32>
    %c0_3 = arith.constant 0 : index
    %c0_4 = arith.constant 0 : index
    %3 = vector.load %arg3[%c0_3, %c0_4] : memref<1x32xf32, #tpu.memory_space<vmem>>, vector<1x32xf32>
    %4 = vector.broadcast %3 : vector<1x32xf32> to vector<16x32xf32>
    %5 = arith.addf %2, %4 : vector<16x32xf32>
    %6 = arith.negf %5 : vector<16x32xf32>
    %7 = math.exp %6 : vector<16x32xf32>
    %cst_5 = arith.constant 1.000000e+00 : f32
    %8 = vector.broadcast %cst_5 : f32 to vector<16x32xf32>
    %9 = arith.addf %8, %7 : vector<16x32xf32>
    %10 = arith.divf %8, %9 : vector<16x32xf32>
    %c0_6 = arith.constant 0 : index
    %c0_7 = arith.constant 0 : index
    %11 = vector.load %arg4[%c0_6, %c0_7] : memref<32x32xf32, #tpu.memory_space<vmem>>, vector<32x32xf32>
    %cst_8 = arith.constant dense<0.000000e+00> : vector<16x32xf32>
    %12 = tpu.matmul %10, %11, %cst_8 {dimension_numbers = #tpu.dot_dimension_numbers<[1], [0], [0], [1], [0, 0, 1, 1], [], []>} : vector<16x32xf32>, vector<32x32xf32>, vector<16x32xf32> -> vector<16x32xf32>
    %c0_9 = arith.constant 0 : index
    %c0_10 = arith.constant 0 : index
    %13 = vector.load %arg5[%c0_9, %c0_10] : memref<1x32xf32, #tpu.memory_space<vmem>>, vector<1x32xf32>
    %14 = vector.broadcast %13 : vector<1x32xf32> to vector<16x32xf32>
    %15 = arith.addf %12, %14 : vector<16x32xf32>
    %cst_11 = arith.constant 0.000000e+00 : f32
    %16 = vector.broadcast %cst_11 : f32 to vector<16x32xf32>
    %17 = arith.maximumf %15, %16 : vector<16x32xf32>
    %c0_12 = arith.constant 0 : index
    %c0_13 = arith.constant 0 : index
    %18 = vector.load %arg6[%c0_12, %c0_13] : memref<32x4xf32, #tpu.memory_space<vmem>>, vector<32x4xf32>
    %cst_14 = arith.constant dense<0.000000e+00> : vector<16x4xf32>
    %19 = tpu.matmul %17, %18, %cst_14 {dimension_numbers = #tpu.dot_dimension_numbers<[1], [0], [0], [1], [0, 0, 1, 1], [], []>} : vector<16x32xf32>, vector<32x4xf32>, vector<16x4xf32> -> vector<16x4xf32>
    %c0_15 = arith.constant 0 : index
    %c0_16 = arith.constant 0 : index
    %20 = vector.load %arg7[%c0_15, %c0_16] : memref<1x4xf32, #tpu.memory_space<vmem>>, vector<1x4xf32>
    %21 = vector.broadcast %20 : vector<1x4xf32> to vector<16x4xf32>
    %22 = arith.addf %19, %21 : vector<16x4xf32>
    %c0_17 = arith.constant 0 : index
    %c0_18 = arith.constant 0 : index
    %23 = vector.load %arg8[%c0_17, %c0_18] : memref<16x4xf32, #tpu.memory_space<vmem>>, vector<16x4xf32>
    tpu.vector_store %arg8[%c0_17, %c0_18], %22 {strides = array<i32>} : memref<16x4xf32, #tpu.memory_space<vmem>>, vector<16x4xf32>,
    return
  }
  func.func @transform_0(%arg0: i32) -> (i32, i32) {
    %c0_i32 = arith.constant 0 : i32
    %c0_i32_0 = arith.constant 0 : i32
    return %arg0, %c0_i32 : i32, i32
  }
  func.func @transform_1(%arg0: i32) -> (i32, i32) {
    %c0_i32 = arith.constant 0 : i32
    %c0_i32_0 = arith.constant 0 : i32
    %c0_i32_1 = arith.constant 0 : i32
    return %c0_i32, %c0_i32_0 : i32, i32
  }
  func.func @transform_2(%arg0: i32) -> (i32, i32) {
    %c0_i32 = arith.constant 0 : i32
    %c0_i32_0 = arith.constant 0 : i32
    %c0_i32_1 = arith.constant 0 : i32
    return %c0_i32, %c0_i32_0 : i32, i32
  }
  func.func @transform_3(%arg0: i32) -> (i32, i32) {
    %c0_i32 = arith.constant 0 : i32
    %c0_i32_0 = arith.constant 0 : i32
    %c0_i32_1 = arith.constant 0 : i32
    return %c0_i32, %c0_i32_0 : i32, i32
  }
  func.func @transform_4(%arg0: i32) -> (i32, i32) {
    %c0_i32 = arith.constant 0 : i32
    %c0_i32_0 = arith.constant 0 : i32
    %c0_i32_1 = arith.constant 0 : i32
    return %c0_i32, %c0_i32_0 : i32, i32
  }
  func.func @transform_5(%arg0: i32) -> (i32, i32) {
    %c0_i32 = arith.constant 0 : i32
    %c0_i32_0 = arith.constant 0 : i32
    %c0_i32_1 = arith.constant 0 : i32
    return %c0_i32, %c0_i32_0 : i32, i32
  }
  func.func @transform_6(%arg0: i32) -> (i32, i32) {
    %c0_i32 = arith.constant 0 : i32
    %c0_i32_0 = arith.constant 0 : i32
    %c0_i32_1 = arith.constant 0 : i32
    return %c0_i32, %c0_i32_0 : i32, i32
  }
  func.func @transform_7(%arg0: i32) -> (i32, i32) {
    %c0_i32 = arith.constant 0 : i32
    %c0_i32_0 = arith.constant 0 : i32
    return %arg0, %c0_i32 : i32, i32
  }
}

</mosaic_0001>

<bundles_post_ra>
// kernel: hidden_sigmoid_hidden_relu.1
= control target key start
LH: loop header
LB: loop body
LE: loop exit
PB: predicated region body
PF: predicated region fallthrough
CT: control target
= control target key end

     0   :  { %vm34_vm0 = vcmask 130048   ;;  %vm110_vm4 = vcmask 261120   ;;  %vm179_vm10 = vcmask 31744   ;;  %s304_s1 = inlined_call_operand.vmem [shape: f32[16,32], index: 1, kind: input, shape index: {}]   ;;  %s305_s0 = inlined_call_operand.vmem [shape: f32[16,16], index: 0, kind: input, shape index: {}]   ;;  %s306_s2 = inlined_call_operand.vmem [shape: f32[1,32], index: 2, kind: input, shape index: {}]   ;;  %s307_s4 = inlined_call_operand.vmem [shape: f32[1,32], index: 4, kind: input, shape index: {}]   ;;  %s308_s3 = inlined_call_operand.vmem [shape: f32[32,32], index: 3, kind: input, shape index: {}]   ;;  %s309_s5 = inlined_call_operand.vmem [shape: f32[32,4], index: 5, kind: input, shape index: {}]   ;;  %s310_s6 = inlined_call_operand.vmem [shape: f32[1,4], index: 6, kind: input, shape index: {}]   ;;  %s311_s7 = inlined_call_operand.vmem [shape: f32[16,4], index: 7, kind: output, shape index: {}]  }
   0x1   :  { %v29_v0 = vld [vmem:[%s304_s1 + $0x8] sm:$0xff]  ;;  %v28_v1 = vld [vmem:[%s304_s1] sm:$0xff]  ;;  %v105_v4 = vld [vmem:[%s308_s3 + $0x18] sm:$0xff] }
   0x2   :  { %55 = vmatpush.msra.mxu0 %v29_v0  ;;  %v26_v2 = vld [vmem:[%s305_s0] sm:$0xff]  ;;  %v27_v3 = vld [vmem:[%s305_s0 + $0x8] sm:$0xff]  ;;  %v104_v5 = vld [vmem:[%s308_s3 + $0x10] sm:$0xff]  ;;  %129 = vmatpush.msra.mxu1 %v105_v4 }
   0x3   :  { %194 = vmatpush.msra.mxu3 %v105_v4  ;;  %v103_v6 = vld [vmem:[%s308_s3 + $0x8] sm:$0xff]  ;;  %v102_v7 = vld [vmem:[%s308_s3] sm:$0xff]  ;;  %v145_v12 = vld [vmem:[%s309_s5 + $0x18] sm:$0xff] }
   0x4   :  { %56 = vmatpush.msra.mxu0 %v28_v1  ;;  %130 = vmatpush.msra.mxu1 %v104_v5  ;;  %v198_v8 = vld [vmem:[%s306_s2] ss:$0 sm:$0xff]  ;;  %v144_v40 = vld [vmem:[%s309_s5 + $0x10] sm:$0xff]  ;;  %v143_v41 = vld [vmem:[%s309_s5 + $0x8] sm:$0xff] }
   0x5   :  { %186 = vmatmul.msk.f32.vlgmr.msra.gmra.mxu0 %vm34_vm0, %v26_v2  ;;  %195 = vmatpush.msra.mxu3 %v104_v5  ;;  %v142_v42 = vld [vmem:[%s309_s5] sm:$0xff] }
   0x6   :  { %131 = vmatpush.msra.mxu1 %v103_v6  ;;  %168 = vmatpush.msra.mxu2 %v145_v12  ;;  %v199_v43 = vld [vmem:[%s307_s4] ss:$0 sm:$0xff] }
   0x7   :  { %196 = vmatpush.msra.mxu3 %v103_v6  ;;  %v200_v50 = vld [vmem:[%s310_s6] ss:$0 sm:$0xff] }
   0x8   :  { %132 = vmatpush.msra.mxu1 %v102_v7  ;;  %169 = vmatpush.msra.mxu2 %v144_v40 }
   0x9   :  { %197 = vmatpush.msra.mxu3 %v102_v7 }
   0xa   :  { %170 = vmatpush.msra.mxu2 %v143_v41 }
   0xc   :  { %171 = vmatpush.msra.mxu2 %v142_v42 }
   0xd   :  { %187 = vmatmul.msk.f32.gmra.mxu0 %vm34_vm0, %v27_v3 }
  0x82   :  { %v58_v9 = vpop.f32.mrf.mxu0 }
  0x83   :  { %v59_v10 = vadd.f32 %v198_v8, %v58_v9 }
  0x85   :  { %v188_v11 = vmul.f32 -1.442695, %v59_v10 }
  0x87   :  { %201 = vpow2.f32 %v188_v11 }
  0x8a   :  { %v61_v13 = vpop.f32.mrf.mxu0 }
  0x8b   :  { %v62_v14 = vadd.f32 %v198_v8, %v61_v13 }
  0x8d   :  { %v202_v15 = vpop.eup %201  ;;  %v189_v16 = vmul.f32 -1.442695, %v62_v14 }
  0x8e   :  { %v70_v17 = vadd.f32 1.0, %v202_v15 }
  0x8f   :  { %203 = vpow2.f32 %v189_v16 }
  0x90   :  { %205 = vrcp.f32 %v70_v17  ;;  %v83_v23 = vand.u32 2147483648, %v70_v17  ;;  %v81_v25 = vand.u32 2147483647, %v70_v17  ;;  %vm77_vm2 = vweird.f32 %v70_v17 }
  0x92   :  { %v84_v28 = vor.u32 1.1754944e-38, %v83_v23  ;;  %vm82_vm5 = vcmp.eq.f32.partialorder %v81_v25, 8.507059e+37 }
  0x95   :  { %v204_v18 = vpop.eup %203 }
  0x96   :  { %v206_v19 = vpop.eup %205  ;;  %v71_v20 = vadd.f32 1.0, %v204_v18 }
  0x97   :  { %v73_v21 = vmul.f32 %v206_v19, %v70_v17  ;;  %vm78_vm1 = vweird.f32 %v206_v19 }
  0x98   :  { %207 = vrcp.f32 %v71_v20  ;;  %vm79_vm3 = vmor %vm77_vm2, %vm78_vm1  ;;  %v98_v33 = vand.u32 2147483648, %v71_v20  ;;  %v96_v35 = vand.u32 2147483647, %v71_v20  ;;  %vm92_vm7 = vweird.f32 %v71_v20 }
  0x99   :  { %v74_v22 = vsub.f32 1.0, %v73_v21 }
  0x9a   :  { %v99_v37 = vor.u32 1.1754944e-38, %v98_v33  ;;  %vm97_vm9 = vcmp.eq.f32.partialorder %v96_v35, 8.507059e+37 }
  0x9b   :  { %v75_v24 = vmul.f32 %v206_v19, %v74_v22 }
  0x9d   :  { %v76_v26 = vadd.f32 %v206_v19, %v75_v24 }
  0x9e   :  { %v208_v27 = vpop.eup %207 }
  0x9f   :  { %v80_v29 = vsel %vm79_vm3, %v206_v19, %v76_v26  ;;  %v88_v30 = vmul.f32 %v208_v27, %v71_v20  ;;  %vm93_vm6 = vweird.f32 %v208_v27 }
  0xa0   :  { %v85_v31 = vsel %vm82_vm5, %v84_v28, %v80_v29  ;;  %vm94_vm8 = vmor %vm92_vm7, %vm93_vm6 }
  0xa1   :  { %190 = vmatmul.msk.f32.vlgmr.msra.gmra.mxu1 %vm110_vm4, %v85_v31  ;;  %v89_v32 = vsub.f32 1.0, %v88_v30 }
  0xa3   :  { %v90_v34 = vmul.f32 %v208_v27, %v89_v32 }
  0xa5   :  { %v91_v36 = vadd.f32 %v208_v27, %v90_v34 }
  0xa7   :  { %v95_v38 = vsel %vm94_vm8, %v208_v27, %v91_v36 }
  0xa8   :  { %v100_v39 = vsel %vm97_vm9, %v99_v37, %v95_v38 }
  0xa9   :  { %191 = vmatmul.msk.f32.vlgmr.msra.gmra.mxu3 %vm110_vm4, %v100_v39 }
 0x11e   :  { %v134_v44 = vpop.f32.mrf.mxu1 }
 0x11f   :  { %v135_v45 = vadd.f32 %v199_v43, %v134_v44 }
 0x121   :  { %v140_v46 = vmax.f32 %v135_v45, 0.0 }
 0x123   :  { %192 = vmatmul.msk.f32.vlgmr.msra.gmra.mxu2 %vm110_vm4, %v140_v46 }
 0x12c   :  { %v137_v47 = vpop.f32.mrf.mxu3 }
 0x12d   :  { %v138_v48 = vadd.f32 %v199_v43, %v137_v47 }
 0x12f   :  { %v141_v49 = vmax.f32 %v138_v48, 0.0 }
 0x131   :  { %193 = vmatmul.msk.f32.gmra.mxu2 %vm110_vm4, %v141_v49 }
 0x1a6   :  { %v173_v51 = vpop.f32.mrf.mxu2 }
 0x1a7   :  { %v174_v52 = vadd.f32 %v200_v50, %v173_v51 }
 0x1a9   :  { %180 = vst.msk [vmem:[%s311_s7] sm:$0xff] %vm179_vm10, %v174_v52 }
 0x1b4   :  { %v176_v53 = vpop.f32.mrf.mxu2 }
 0x1b5   :  { %v177_v54 = vadd.f32 %v200_v50, %v176_v53 }
 0x1b7   :  { %181 = vst.msk [vmem:[%s311_s7 + $0x8] sm:$0xff] %vm179_vm10, %v177_v54 }

</bundles_post_ra>
